<compile_context>
chip_gen: v5e
topology: v5e:2x2
jax: 0.10.0
libtpu: 0.0.40
codegen_flags: <defaults>
</compile_context>

<pallas_src>
import functools

import jax
import jax.numpy as jnp
from jax.experimental import pallas as pl
from jax.experimental.pallas import tpu as pltpu


def _round_up(x, m):
    return (x + m - 1) // m * m


def _pad_cols(w, target):
    pad = target - w.shape[1]
    return jnp.pad(w, ((0, 0), (0, pad))) if pad else w


def _momf_kernel(q_ref, s_ref, wcat1_ref, bcat1_ref, wcat2_ref, bcat2_ref,
                 wc2_ref, bc2_ref, o_ref,
                 *, n_agents, embed_dim, h_pad, e_pad, nae_pad):
    f32 = jnp.float32
    s = s_ref[...].astype(f32)          # (blk, state_dim)
    q = q_ref[...].astype(f32)          # (blk, n_agents)

    # ---- stage 1: ONE wide MXU matmul for all four state->hidden linears ----
    # column layout: [ hyper_w1[0] | hyper_w2[0] | hyper_b2[0] | hyper_b1 ]
    pre1 = jnp.dot(s, wcat1_ref[...], preferred_element_type=f32) + bcat1_ref[...]
    act1 = jnp.maximum(pre1, 0.0)

    h12 = act1[:, :2 * h_pad]                         # relu'd inputs of stage 2
    hc = act1[:, 2 * h_pad:2 * h_pad + e_pad]         # relu(hyper_b2 layer 1)
    off_b1 = 2 * h_pad + e_pad
    b1 = pre1[:, off_b1:off_b1 + embed_dim]           # hyper_b1 (no relu)

    # ---- stage 2: block-diagonal matmul fusing hyper_w1[2] and hyper_w2[2] ----
    out2 = jnp.dot(h12, wcat2_ref[...], preferred_element_type=f32) + bcat2_ref[...]
    w1_flat = jnp.abs(out2[:, :n_agents * embed_dim])         # abs=True branch
    w2 = jnp.abs(out2[:, nae_pad:nae_pad + embed_dim])        # (blk, E)

    # hyper_b2 layer 2 has output width 1 -> VPU reduction instead of MXU dot.
    b2 = jnp.sum(hc * wc2_ref[...], axis=-1, keepdims=True) + bc2_ref[...]

    # ---- mixing: hidden = elu(q @ |W1| + b1) per row (q is (1, A) per sample) ----
    acc = b1
    for a in range(n_agents):            # n_agents is small & static
        acc = acc + q[:, a:a + 1] * w1_flat[:, a * embed_dim:(a + 1) * embed_dim]
    hidden = jnp.where(acc > 0.0, acc, jnp.exp(jnp.minimum(acc, 0.0)) - 1.0)  # ELU(1)

    y = jnp.sum(hidden * w2, axis=-1, keepdims=True) + b2     # (blk, 1)
    o_ref[...] = y.astype(o_ref.dtype)


def momf_forward(qvals, states, params, *, n_agents, embed_dim, blk=512):
    """qvals: (B, T, n_agents), states: (B, T, state_dim) -> (B, T, 1)."""
    b, t, _ = qvals.shape
    bt = b * t
    state_dim = params["wb1"].shape[0]
    hyp = params["w1a"].shape[1]
    f32 = jnp.float32

    # ---- row-block selection: big, 256-aligned, but keep >= ~4 grid steps ----
    if bt >= 256:
        blk = _round_up(min(blk, max(256, _round_up(bt // 4, 256))), 256)
    else:
        blk = _round_up(bt, 8)
    bt_pad = _round_up(bt, blk)
    grid = (bt_pad // blk,)

    # ---- pack hypernet weights (segments padded to 128-lane boundaries) ----
    h_pad = _round_up(hyp, 128)
    e_pad = _round_up(embed_dim, 128)
    nae = n_agents * embed_dim
    nae_pad = _round_up(nae, 128)

    wcat1 = jnp.concatenate([
        _pad_cols(params["w1a"].astype(f32), h_pad),
        _pad_cols(params["w2a"].astype(f32), h_pad),
        _pad_cols(params["wc1"].astype(f32), e_pad),
        _pad_cols(params["wb1"].astype(f32), e_pad)], axis=1)
    bcat1 = jnp.concatenate([
        _pad_cols(params["b1a"].astype(f32), h_pad),
        _pad_cols(params["b2a"].astype(f32), h_pad),
        _pad_cols(params["bc1"].astype(f32), e_pad),
        _pad_cols(params["bb1"].astype(f32), e_pad)], axis=1)

    wcat2 = jnp.zeros((2 * h_pad, nae_pad + e_pad), f32)
    wcat2 = wcat2.at[:hyp, :nae].set(params["w1b"].astype(f32))
    wcat2 = wcat2.at[h_pad:h_pad + hyp, nae_pad:nae_pad + embed_dim].set(
        params["w2b"].astype(f32))
    bcat2 = jnp.concatenate([
        _pad_cols(params["b1b"].astype(f32), nae_pad),
        _pad_cols(params["b2b"].astype(f32), e_pad)], axis=1)

    wc2row = _pad_cols(params["wc2"].astype(f32).T, e_pad)    # (1, e_pad)
    bc2 = params["bc2"].astype(f32)                           # (1, 1)

    # ---- flatten rows + zero-pad to a block multiple (sliced off at the end) ----
    q2 = qvals.reshape(bt, n_agents).astype(f32)
    s2 = states.reshape(bt, state_dim).astype(f32)
    if bt_pad != bt:
        q2 = jnp.pad(q2, ((0, bt_pad - bt), (0, 0)))
        s2 = jnp.pad(s2, ((0, bt_pad - bt), (0, 0)))

    def row_spec(d):
        return pl.BlockSpec((blk, d), lambda i: (i, 0))

    def full_spec(arr):
        return pl.BlockSpec(arr.shape, lambda i: (0, 0))

    out = pl.pallas_call(
        functools.partial(_momf_kernel, n_agents=n_agents, embed_dim=embed_dim,
                          h_pad=h_pad, e_pad=e_pad, nae_pad=nae_pad),
        out_shape=jax.ShapeDtypeStruct((bt_pad, 1), f32),
        grid=grid,
        in_specs=[
            row_spec(n_agents),        # qvals rows
            row_spec(state_dim),       # state rows
            full_spec(wcat1), full_spec(bcat1),
            full_spec(wcat2), full_spec(bcat2),
            full_spec(wc2row), full_spec(bc2),
        ],
        out_specs=pl.BlockSpec((blk, 1), lambda i: (i, 0)),
        compiler_params=pltpu.CompilerParams(
            dimension_semantics=("parallel",)),
    )(q2, s2, wcat1, bcat1, wcat2, bcat2, wc2row, bc2)

    return out[:bt].reshape(b, t, 1)


def momf_reference(qvals, states, params, *, n_agents, embed_dim):
    """Pure-JAX reference mirroring the PyTorch forward (abs=True)."""
    b, t, _ = qvals.shape
    bt = b * t
    q = qvals.reshape(bt, 1, n_agents).astype(jnp.float32)
    s = states.reshape(bt, -1).astype(jnp.float32)

    h = jax.nn.relu(s @ params["w1a"] + params["b1a"])
    w1 = (h @ params["w1b"] + params["b1b"]).reshape(bt, n_agents, embed_dim)
    b1 = (s @ params["wb1"] + params["bb1"]).reshape(bt, 1, embed_dim)
    h = jax.nn.relu(s @ params["w2a"] + params["b2a"])
    w2 = (h @ params["w2b"] + params["b2b"]).reshape(bt, embed_dim, 1)
    h = jax.nn.relu(s @ params["wc1"] + params["bc1"])
    b2 = (h @ params["wc2"] + params["bc2"]).reshape(bt, 1, 1)

    w1 = jnp.abs(w1)
    w2 = jnp.abs(w2)
    hidden = jax.nn.elu(jnp.matmul(q, w1) + b1)
    y = jnp.matmul(hidden, w2) + b2
    return y.reshape(b, t, 1)


def init_params(key, *, state_dim, hypernet_embed, n_agents, embed_dim):
    ks = jax.random.split(key, 16)
    def w(k, shape, scale=0.1):
        return scale * jax.random.normal(k, shape, dtype=jnp.float32)
    return {
        "w1a": w(ks[0], (state_dim, hypernet_embed)),
        "b1a": w(ks[1], (1, hypernet_embed)),
        "w1b": w(ks[2], (hypernet_embed, n_agents * embed_dim)),
        "b1b": w(ks[3], (1, n_agents * embed_dim)),
        "wb1": w(ks[4], (state_dim, embed_dim)),
        "bb1": w(ks[5], (1, embed_dim)),
        "w2a": w(ks[6], (state_dim, hypernet_embed)),
        "b2a": w(ks[7], (1, hypernet_embed)),
        "w2b": w(ks[8], (hypernet_embed, embed_dim)),
        "b2b": w(ks[9], (1, embed_dim)),
        "wc1": w(ks[10], (state_dim, embed_dim)),
        "bc1": w(ks[11], (1, embed_dim)),
        "wc2": w(ks[12], (embed_dim, 1)),
        "bc2": w(ks[13], (1, 1)),
    }


if __name__ == "__main__":
    N_AGENTS = 4
    EMBED_DIM = 32
    HYPERNET_EMBED = 64
    STATE_DIM = 32

    key = jax.random.PRNGKey(0)
    kq, ks, kp, kq2, ks2 = jax.random.split(key, 5)
    params = init_params(kp, state_dim=STATE_DIM, hypernet_embed=HYPERNET_EMBED,
                         n_agents=N_AGENTS, embed_dim=EMBED_DIM)

    # Case 1: small shapes consistent with the module's forward.
    B, T = 2, 8
    qvals = jax.random.normal(kq, (B, T, N_AGENTS), dtype=jnp.float32)
    states = jax.random.normal(ks, (B, T, STATE_DIM), dtype=jnp.float32)
    out = jax.block_until_ready(
        momf_forward(qvals, states, params, n_agents=N_AGENTS, embed_dim=EMBED_DIM))
    ref = momf_reference(qvals, states, params, n_agents=N_AGENTS, embed_dim=EMBED_DIM)
    assert out.shape == (B, T, 1)
    assert jnp.allclose(out, ref, atol=2e-4, rtol=2e-4), "mismatch vs reference (case 1)"

    # Case 2: larger, non-divisible B*T to exercise big blocks, padding and
    # a multi-step parallel grid.
    B2, T2 = 4, 130   # bt = 520 -> blk = 256, padded to 768, grid = 3
    qvals2 = jax.random.normal(kq2, (B2, T2, N_AGENTS), dtype=jnp.float32)
    states2 = jax.random.normal(ks2, (B2, T2, STATE_DIM), dtype=jnp.float32)
    out2 = jax.block_until_ready(
        momf_forward(qvals2, states2, params, n_agents=N_AGENTS, embed_dim=EMBED_DIM))
    ref2 = momf_reference(qvals2, states2, params, n_agents=N_AGENTS, embed_dim=EMBED_DIM)
    assert out2.shape == (B2, T2, 1)
    assert jnp.allclose(out2, ref2, atol=2e-4, rtol=2e-4), "mismatch vs reference (case 2)"

    print("KERNEL_OK")
</pallas_src>

<mosaic_0001>
module attributes {stable_mosaic.version = 11 : i64} {
  func.func @_momf_kernel(%arg0: i32, %arg1: memref<16x4xf32, #tpu.memory_space<vmem>>, %arg2: memref<16x32xf32, #tpu.memory_space<vmem>>, %arg3: memref<32x512xf32, #tpu.memory_space<vmem>>, %arg4: memref<1x512xf32, #tpu.memory_space<vmem>>, %arg5: memref<256x256xf32, #tpu.memory_space<vmem>>, %arg6: memref<1x256xf32, #tpu.memory_space<vmem>>, %arg7: memref<1x128xf32, #tpu.memory_space<vmem>>, %arg8: memref<1x1xf32, #tpu.memory_space<vmem>>, %arg9: memref<16x1xf32, #tpu.memory_space<vmem>>) attributes {dimension_semantics = [#tpu.dimension_semantics<parallel>], iteration_bounds = array<i64: 1>, scalar_prefetch = 0 : i64, scratch_operands = 0 : i64, tpu.core_type = #tpu.core_type<tc>, window_params = [{transform_indices = @transform_0, window_bounds = array<i64: 16, 4>}, {transform_indices = @transform_1, window_bounds = array<i64: 16, 32>}, {pipeline_mode = #tpu.pipeline_mode<synchronous>, transform_indices = @transform_2, window_bounds = array<i64: 32, 512>}, {pipeline_mode = #tpu.pipeline_mode<synchronous>, transform_indices = @transform_3, window_bounds = array<i64: 1, 512>}, {pipeline_mode = #tpu.pipeline_mode<synchronous>, transform_indices = @transform_4, window_bounds = array<i64: 256, 256>}, {pipeline_mode = #tpu.pipeline_mode<synchronous>, transform_indices = @transform_5, window_bounds = array<i64: 1, 256>}, {pipeline_mode = #tpu.pipeline_mode<synchronous>, transform_indices = @transform_6, window_bounds = array<i64: 1, 128>}, {pipeline_mode = #tpu.pipeline_mode<synchronous>, transform_indices = @transform_7, window_bounds = array<i64: 1, 1>}, {transform_indices = @transform_8, window_bounds = array<i64: 16, 1>}]} {
    %c0 = arith.constant 0 : index
    %c0_0 = arith.constant 0 : index
    %0 = vector.load %arg2[%c0, %c0_0] : memref<16x32xf32, #tpu.memory_space<vmem>>, vector<16x32xf32>
    %c0_1 = arith.constant 0 : index
    %c0_2 = arith.constant 0 : index
    %1 = vector.load %arg1[%c0_1, %c0_2] : memref<16x4xf32, #tpu.memory_space<vmem>>, vector<16x4xf32>
    %c0_3 = arith.constant 0 : index
    %c0_4 = arith.constant 0 : index
    %2 = vector.load %arg3[%c0_3, %c0_4] : memref<32x512xf32, #tpu.memory_space<vmem>>, vector<32x512xf32>
    %cst = arith.constant dense<0.000000e+00> : vector<16x512xf32>
    %3 = tpu.matmul %0, %2, %cst {dimension_numbers = #tpu.dot_dimension_numbers<[1], [0], [0], [1], [0, 0, 1, 1], [], []>} : vector<16x32xf32>, vector<32x512xf32>, vector<16x512xf32> -> vector<16x512xf32>
    %c0_5 = arith.constant 0 : index
    %c0_6 = arith.constant 0 : index
    %4 = vector.load %arg4[%c0_5, %c0_6] : memref<1x512xf32, #tpu.memory_space<vmem>>, vector<1x512xf32>
    %5 = vector.broadcast %4 : vector<1x512xf32> to vector<16x512xf32>
    %6 = arith.addf %3, %5 : vector<16x512xf32>
    %cst_7 = arith.constant 0.000000e+00 : f32
    %7 = vector.broadcast %cst_7 : f32 to vector<16x512xf32>
    %8 = arith.maximumf %6, %7 : vector<16x512xf32>
    %9 = vector.extract_strided_slice %8 {offsets = [0, 0], sizes = [16, 256], strides = [1, 1]} : vector<16x512xf32> to vector<16x256xf32>
    %10 = vector.extract_strided_slice %8 {offsets = [0, 256], sizes = [16, 128], strides = [1, 1]} : vector<16x512xf32> to vector<16x128xf32>
    %11 = vector.extract_strided_slice %6 {offsets = [0, 384], sizes = [16, 32], strides = [1, 1]} : vector<16x512xf32> to vector<16x32xf32>
    %c0_8 = arith.constant 0 : index
    %c0_9 = arith.constant 0 : index
    %12 = vector.load %arg5[%c0_8, %c0_9] : memref<256x256xf32, #tpu.memory_space<vmem>>, vector<256x256xf32>
    %cst_10 = arith.constant dense<0.000000e+00> : vector<16x256xf32>
    %13 = tpu.matmul %9, %12, %cst_10 {dimension_numbers = #tpu.dot_dimension_numbers<[1], [0], [0], [1], [0, 0, 1, 1], [], []>} : vector<16x256xf32>, vector<256x256xf32>, vector<16x256xf32> -> vector<16x256xf32>
    %c0_11 = arith.constant 0 : index
    %c0_12 = arith.constant 0 : index
    %14 = vector.load %arg6[%c0_11, %c0_12] : memref<1x256xf32, #tpu.memory_space<vmem>>, vector<1x256xf32>
    %15 = vector.broadcast %14 : vector<1x256xf32> to vector<16x256xf32>
    %16 = arith.addf %13, %15 : vector<16x256xf32>
    %17 = vector.extract_strided_slice %16 {offsets = [0, 0], sizes = [16, 128], strides = [1, 1]} : vector<16x256xf32> to vector<16x128xf32>
    %18 = math.absf %17 : vector<16x128xf32>
    %19 = vector.extract_strided_slice %16 {offsets = [0, 128], sizes = [16, 32], strides = [1, 1]} : vector<16x256xf32> to vector<16x32xf32>
    %20 = math.absf %19 : vector<16x32xf32>
    %c0_13 = arith.constant 0 : index
    %c0_14 = arith.constant 0 : index
    %21 = vector.load %arg7[%c0_13, %c0_14] : memref<1x128xf32, #tpu.memory_space<vmem>>, vector<1x128xf32>
    %22 = vector.broadcast %21 : vector<1x128xf32> to vector<16x128xf32>
    %23 = arith.mulf %10, %22 : vector<16x128xf32>
    %cst_15 = arith.constant dense<0.000000e+00> : vector<16xf32>
    %24 = vector.multi_reduction <add>, %23, %cst_15 [1] : vector<16x128xf32> to vector<16xf32>
    %25 = vector.shape_cast %24 : vector<16xf32> to vector<16x1xf32>
    %c0_16 = arith.constant 0 : index
    %c0_17 = arith.constant 0 : index
    %26 = vector.load %arg8[%c0_16, %c0_17] : memref<1x1xf32, #tpu.memory_space<vmem>>, vector<1x1xf32>
    %27 = vector.broadcast %26 : vector<1x1xf32> to vector<16x1xf32>
    %28 = arith.addf %25, %27 : vector<16x1xf32>
    %29 = vector.extract_strided_slice %1 {offsets = [0, 0], sizes = [16, 1], strides = [1, 1]} : vector<16x4xf32> to vector<16x1xf32>
    %30 = vector.extract_strided_slice %18 {offsets = [0, 0], sizes = [16, 32], strides = [1, 1]} : vector<16x128xf32> to vector<16x32xf32>
    %31 = vector.broadcast %29 : vector<16x1xf32> to vector<16x32xf32>
    %32 = arith.mulf %31, %30 : vector<16x32xf32>
    %33 = arith.addf %11, %32 : vector<16x32xf32>
    %34 = vector.extract_strided_slice %1 {offsets = [0, 1], sizes = [16, 1], strides = [1, 1]} : vector<16x4xf32> to vector<16x1xf32>
    %35 = vector.extract_strided_slice %18 {offsets = [0, 32], sizes = [16, 32], strides = [1, 1]} : vector<16x128xf32> to vector<16x32xf32>
    %36 = vector.broadcast %34 : vector<16x1xf32> to vector<16x32xf32>
    %37 = arith.mulf %36, %35 : vector<16x32xf32>
    %38 = arith.addf %33, %37 : vector<16x32xf32>
    %39 = vector.extract_strided_slice %1 {offsets = [0, 2], sizes = [16, 1], strides = [1, 1]} : vector<16x4xf32> to vector<16x1xf32>
    %40 = vector.extract_strided_slice %18 {offsets = [0, 64], sizes = [16, 32], strides = [1, 1]} : vector<16x128xf32> to vector<16x32xf32>
    %41 = vector.broadcast %39 : vector<16x1xf32> to vector<16x32xf32>
    %42 = arith.mulf %41, %40 : vector<16x32xf32>
    %43 = arith.addf %38, %42 : vector<16x32xf32>
    %44 = vector.extract_strided_slice %1 {offsets = [0, 3], sizes = [16, 1], strides = [1, 1]} : vector<16x4xf32> to vector<16x1xf32>
    %45 = vector.extract_strided_slice %18 {offsets = [0, 96], sizes = [16, 32], strides = [1, 1]} : vector<16x128xf32> to vector<16x32xf32>
    %46 = vector.broadcast %44 : vector<16x1xf32> to vector<16x32xf32>
    %47 = arith.mulf %46, %45 : vector<16x32xf32>
    %48 = arith.addf %43, %47 : vector<16x32xf32>
    %cst_18 = arith.constant 0.000000e+00 : f32
    %49 = vector.broadcast %cst_18 : f32 to vector<16x32xf32>
    %50 = arith.cmpf ogt, %48, %49 : vector<16x32xf32>
    %cst_19 = arith.constant 0.000000e+00 : f32
    %51 = vector.broadcast %cst_19 : f32 to vector<16x32xf32>
    %52 = arith.minimumf %48, %51 : vector<16x32xf32>
    %53 = math.exp %52 : vector<16x32xf32>
    %cst_20 = arith.constant 1.000000e+00 : f32
    %54 = vector.broadcast %cst_20 : f32 to vector<16x32xf32>
    %55 = arith.subf %53, %54 : vector<16x32xf32>
    %56 = arith.select %50, %48, %55 : vector<16x32xi1>, vector<16x32xf32>
    %57 = arith.mulf %56, %20 : vector<16x32xf32>
    %cst_21 = arith.constant dense<0.000000e+00> : vector<16xf32>
    %58 = vector.multi_reduction <add>, %57, %cst_21 [1] : vector<16x32xf32> to vector<16xf32>
    %59 = vector.shape_cast %58 : vector<16xf32> to vector<16x1xf32>
    %60 = arith.addf %59, %28 : vector<16x1xf32>
    %c0_22 = arith.constant 0 : index
    %c0_23 = arith.constant 0 : index
    %61 = vector.load %arg9[%c0_22, %c0_23] : memref<16x1xf32, #tpu.memory_space<vmem>>, vector<16x1xf32>
    tpu.vector_store %arg9[%c0_22, %c0_23], %60 {strides = array<i32>} : memref<16x1xf32, #tpu.memory_space<vmem>>, vector<16x1xf32>,
    return
  }
  func.func @transform_0(%arg0: i32) -> (i32, i32) {
    %c0_i32 = arith.constant 0 : i32
    %c0_i32_0 = arith.constant 0 : i32
    return %arg0, %c0_i32 : i32, i32
  }
  func.func @transform_1(%arg0: i32) -> (i32, i32) {
    %c0_i32 = arith.constant 0 : i32
    %c0_i32_0 = arith.constant 0 : i32
    return %arg0, %c0_i32 : i32, i32
  }
  func.func @transform_2(%arg0: i32) -> (i32, i32) {
    %c0_i32 = arith.constant 0 : i32
    %c0_i32_0 = arith.constant 0 : i32
    %c0_i32_1 = arith.constant 0 : i32
    return %c0_i32, %c0_i32_0 : i32, i32
  }
  func.func @transform_3(%arg0: i32) -> (i32, i32) {
    %c0_i32 = arith.constant 0 : i32
    %c0_i32_0 = arith.constant 0 : i32
    %c0_i32_1 = arith.constant 0 : i32
    return %c0_i32, %c0_i32_0 : i32, i32
  }
  func.func @transform_4(%arg0: i32) -> (i32, i32) {
    %c0_i32 = arith.constant 0 : i32
    %c0_i32_0 = arith.constant 0 : i32
    %c0_i32_1 = arith.constant 0 : i32
    return %c0_i32, %c0_i32_0 : i32, i32
  }
  func.func @transform_5(%arg0: i32) -> (i32, i32) {
    %c0_i32 = arith.constant 0 : i32
    %c0_i32_0 = arith.constant 0 : i32
    %c0_i32_1 = arith.constant 0 : i32
    return %c0_i32, %c0_i32_0 : i32, i32
  }
  func.func @transform_6(%arg0: i32) -> (i32, i32) {
    %c0_i32 = arith.constant 0 : i32
    %c0_i32_0 = arith.constant 0 : i32
    %c0_i32_1 = arith.constant 0 : i32
    return %c0_i32, %c0_i32_0 : i32, i32
  }
  func.func @transform_7(%arg0: i32) -> (i32, i32) {
    %c0_i32 = arith.constant 0 : i32
    %c0_i32_0 = arith.constant 0 : i32
    %c0_i32_1 = arith.constant 0 : i32
    return %c0_i32, %c0_i32_0 : i32, i32
  }
  func.func @transform_8(%arg0: i32) -> (i32, i32) {
    %c0_i32 = arith.constant 0 : i32
    %c0_i32_0 = arith.constant 0 : i32
    return %arg0, %c0_i32 : i32, i32
  }
}

</mosaic_0001>

<bundles_post_ra>
// kernel: tpu_custom_call.1
= control target key start
LH: loop header
LB: loop body
LE: loop exit
PB: predicated region body
PF: predicated region fallthrough
CT: control target
= control target key end

     0   :  { %s699_s0 = inlined_call_operand.vmem [shape: f32[16,4], index: 0, kind: input, shape index: {}]   ;;  %s700_s1 = inlined_call_operand.vmem [shape: f32[16,32], index: 1, kind: input, shape index: {}]   ;;  %s701_s2 = inlined_call_operand.hbm [shape: f32[32,512], index: 2, kind: input, shape index: {}]   ;;  %s702_s3 = inlined_call_operand.vmem [shape: f32[1,512], index: 3, kind: input, shape index: {}]   ;;  %s703_s4 = inlined_call_operand.hbm [shape: f32[256,256], index: 4, kind: input, shape index: {}]   ;;  %s704_s5 = inlined_call_operand.vmem [shape: f32[1,256], index: 5, kind: input, shape index: {}]   ;;  %s705_s6 = inlined_call_operand.vmem [shape: f32[1,128], index: 6, kind: input, shape index: {}]   ;;  %s706_s7 = inlined_call_operand.<no memory space> [shape: f32[1,1], index: 7, kind: input, shape index: {}]   ;;  %s707_s8 = inlined_call_operand.vmem [shape: f32[16,1], index: 8, kind: output, shape index: {}]  }
   0x1   :  { %v13_v0 = vstv %s706_s7 }
   0x2   :  { %14 = vst [vmem:[#allocation2] sm:$0x1] %v13_v0 }
   0x3   :  { %15 = vsyncpa [#allocation4], 0  ;;  %s25_s9 = sshll.u32 %s701_s2, 4  ;;  %s26_s9 = int_to_ptr.hbm [resolvable:$true] %s25_s9 }
   0x4   :  { %16 = vsyncpa [#allocation6], 0  ;;  %s571_s10 = smov [#allocation3]   ;;  %s40_s14 = sshll.u32 %s703_s4, 4  ;;  %s41_s14 = int_to_ptr.hbm [resolvable:$true] %s40_s14 }
   0x5   :  { %s27_s11 = sshll.u32 %s571_s10, 4  ;;  %s572_s15 = smov 512   ;;  %s28_s11 = int_to_ptr.vmem [resolvable:$true] %s27_s11 }
   0x6   :  { %s573_s16 = smov 32   ;;  %s574_s7 = smov [#allocation5]  }
   0x7   :  { %33 = dma.hbm_to_vmem [thread:$0]  %s26_s9, 2048, %s28_s11, [#allocation4], %s572_s15, %s572_s15, %s573_s16  }
   0x8   :  { %s42_s17 = sshll.u32 %s574_s7, 4  ;;  %s575_s18 = smov 256   ;;  %s43_s17 = int_to_ptr.vmem [resolvable:$true] %s42_s17 }
   0x9   :  { %s576_s19 = smov 16  }
   0xa   :  { %48 = dma.hbm_to_vmem [thread:$0]  %s41_s14, 8192, %s43_s17, [#allocation6], %s575_s18, %s575_s18, %s576_s19  }
   0xb   :  { %567 = dma.done.wait [#allocation4], 2048  }
   0xc   :  { %568 = vsyncadd [#allocation4], 4294965248 }
   0xd   :  { %569 = dma.done.wait [#allocation6], 8192  }
   0xe   :  { %570 = vsyncadd [#allocation6], 4294959104  ;;  %v79_v1 = vld [vmem:[#allocation3 + $0x60] sm:$0xff]  ;;  %v80_v3 = vld [vmem:[#allocation3 + $0x68] sm:$0xff]  ;;  %vm93_vm0 = vcmask 261120   ;;  %s581_s27 = smov 96  }
   0xf   :  { %v75_v2 = vld [vmem:[#allocation3 + $0x40] sm:$0xff]  ;;  %112 = vmatpush.msra.mxu0 %v79_v1  ;;  %135 = vmatpush.msra.mxu1 %v80_v3  ;;  %v76_v4 = vld [vmem:[#allocation3 + $0x48] sm:$0xff]  ;;  %v81_v7 = vld [vmem:[#allocation3 + $0x70] sm:$0xff]  ;;  %vm476_vm3 = vcmask 7168  }
  0x10   :  { %v71_v5 = vld [vmem:[#allocation3 + $0x20] sm:$0xff]  ;;  %v72_v6 = vld [vmem:[#allocation3 + $0x28] sm:$0xff]  ;;  %v77_v8 = vld [vmem:[#allocation3 + $0x50] sm:$0xff]  ;;  %158 = vmatpush.msra.mxu2 %v81_v7 }
  0x11   :  { %113 = vmatpush.msra.mxu0 %v75_v2  ;;  %136 = vmatpush.msra.mxu1 %v76_v4  ;;  %v67_v9 = vld [vmem:[#allocation3] sm:$0xff]  ;;  %v68_v10 = vld [vmem:[#allocation3 + $0x8] sm:$0xff]  ;;  %v82_v11 = vld [vmem:[#allocation3 + $0x78] sm:$0xff] }
  0x12   :  { %v641_v12 = vld [vmem:[%s700_s1] sm:$0xff]  ;;  %159 = vmatpush.msra.mxu2 %v77_v8  ;;  %181 = vmatpush.msra.mxu3 %v82_v11  ;;  %v73_v13 = vld [vmem:[#allocation3 + $0x30] sm:$0xff]  ;;  %v227_v23 = vld [vmem:[#allocation5 + $0xe8] sm:$0xff] }
  0x13   :  { %114 = vmatpush.msra.mxu0 %v71_v5  ;;  %137 = vmatpush.msra.mxu1 %v72_v6  ;;  %v78_v14 = vld [vmem:[#allocation3 + $0x58] sm:$0xff]  ;;  %v228_v15 = vld [vmem:[#allocation5 + $0xf0] sm:$0xff]  ;;  %v226_v20 = vld [vmem:[#allocation5 + $0xe0] sm:$0xff] }
  0x14   :  { %v260_v16 = vld [vmem:[#allocation5 + $0x1f0] sm:$0xff]  ;;  %v74_v18 = vld [vmem:[#allocation3 + $0x38] sm:$0xff]  ;;  %160 = vmatpush.msra.mxu2 %v73_v13  ;;  %182 = vmatpush.msra.mxu3 %v78_v14  ;;  %v258_v22 = vld [vmem:[#allocation5 + $0x1e0] sm:$0xff] }
  0x15   :  { %115 = vmatpush.msra.mxu0 %v67_v9  ;;  %138 = vmatpush.msra.mxu1 %v68_v10  ;;  %v69_v17 = vld [vmem:[#allocation3 + $0x10] sm:$0xff]  ;;  %v229_v19 = vld [vmem:[#allocation5 + $0xf8] sm:$0xff]  ;;  %v650_v27 = vld [vmem:[%s700_s1 + $0x8] sm:$0xff] }
  0x16   :  { %485 = vmatmul.msk.f32.vlgmr.msra.gmra.mxu0 %vm93_vm0, %v641_v12  ;;  %487 = vmatmul.msk.f32.vlgmr.msra.gmra.mxu1 %vm93_vm0, %v641_v12  ;;  %v70_v21 = vld [vmem:[#allocation3 + $0x18] sm:$0xff]  ;;  %v224_v25 = vld [vmem:[#allocation5 + $0xd0] sm:$0xff]  ;;  %v259_v29 = vld [vmem:[#allocation5 + $0x1e8] sm:$0xff] }
  0x17   :  { %268 = vmatpush.msrb.mxu0 %v228_v15  ;;  %291 = vmatpush.msrb.mxu1 %v260_v16  ;;  %v261_v24 = vld [vmem:[#allocation5 + $0x1f8] sm:$0xff]  ;;  %v256_v26 = vld [vmem:[#allocation5 + $0x1d0] sm:$0xff]  ;;  %v222_v30 = vld [vmem:[#allocation5 + $0xc0] sm:$0xff]  ;;  %v577_v16 = vmov 1  }
  0x18   :  { %161 = vmatpush.msra.mxu2 %v69_v17  ;;  %183 = vmatpush.msra.mxu3 %v74_v18  ;;  %v225_v28 = vld [vmem:[#allocation5 + $0xd8] sm:$0xff]  ;;  %v254_v31 = vld [vmem:[#allocation5 + $0x1c0] sm:$0xff]  ;;  %v223_v32 = vld [vmem:[#allocation5 + $0xc8] sm:$0xff] }
  0x19   :  { %269 = vmatpush.msrb.mxu0 %v226_v20  ;;  %292 = vmatpush.msrb.mxu1 %v258_v22  ;;  %v257_v33 = vld [vmem:[#allocation5 + $0x1d8] sm:$0xff]  ;;  %v220_v34 = vld [vmem:[#allocation5 + $0xb0] sm:$0xff]  ;;  %v255_v37 = vld [vmem:[#allocation5 + $0x1c8] sm:$0xff]  ;;  %v578_v22 = vmov 2  }
  0x1a   :  { %314 = vmatpush.msrb.mxu2 %v229_v19  ;;  %184 = vmatpush.msra.mxu3 %v70_v21  ;;  %v252_v35 = vld [vmem:[#allocation5 + $0x1b0] sm:$0xff]  ;;  %v221_v36 = vld [vmem:[#allocation5 + $0xb8] sm:$0xff]  ;;  %v218_v38 = vld [vmem:[#allocation5 + $0xa0] sm:$0xff] }
  0x1b   :  { %270 = vmatpush.msrb.mxu0 %v224_v25  ;;  %293 = vmatpush.msrb.mxu1 %v256_v26  ;;  %v250_v39 = vld [vmem:[#allocation5 + $0x1a0] sm:$0xff]  ;;  %v219_v40 = vld [vmem:[#allocation5 + $0xa8] sm:$0xff]  ;;  %v253_v41 = vld [vmem:[#allocation5 + $0x1b8] sm:$0xff] }
  0x1c   :  { %315 = vmatpush.msrb.mxu2 %v227_v23  ;;  %337 = vmatpush.msrb.mxu3 %v261_v24  ;;  %v216_v42 = vld [vmem:[#allocation5 + $0x90] sm:$0xff]  ;;  %v217_v44 = vld [vmem:[#allocation5 + $0x98] sm:$0xff]  ;;  %v251_v45 = vld [vmem:[#allocation5 + $0x1a8] sm:$0xff]  ;;  %v579_v23 = vmov 3   ;;  %v580_v24 = vmov 0  }
  0x1d   :  { %271 = vmatpush.msrb.mxu0 %v222_v30  ;;  %294 = vmatpush.msrb.mxu1 %v254_v31  ;;  %v248_v43 = vld [vmem:[#allocation5 + $0x190] sm:$0xff]  ;;  %v214_v46 = vld [vmem:[#allocation5 + $0x80] sm:$0xff]  ;;  %v215_v47 = vld [vmem:[#allocation5 + $0x88] sm:$0xff] }
  0x1e   :  { %486 = vmatmul.msk.f32.gmra.mxu0 %vm93_vm0, %v650_v27  ;;  %488 = vmatmul.msk.f32.gmra.mxu1 %vm93_vm0, %v650_v27  ;;  %v249_v48 = vld [vmem:[#allocation5 + $0x198] sm:$0xff]  ;;  %v212_v49 = vld [vmem:[#allocation5 + $0x70] sm:$0xff]  ;;  %v246_v50 = vld [vmem:[#allocation5 + $0x180] sm:$0xff] }
  0x1f   :  { %316 = vmatpush.msrb.mxu2 %v225_v28  ;;  %338 = vmatpush.msrb.mxu3 %v259_v29  ;;  %v213_v51 = vld [vmem:[#allocation5 + $0x78] sm:$0xff]  ;;  %v247_v52 = vld [vmem:[#allocation5 + $0x188] sm:$0xff]  ;;  %v210_v53 = vld [vmem:[#allocation5 + $0x60] sm:$0xff] }
  0x20   :  { %272 = vmatpush.msrb.mxu0 %v220_v34  ;;  %295 = vmatpush.msrb.mxu1 %v252_v35  ;;  %v244_v54 = vld [vmem:[#allocation5 + $0x170] sm:$0xff]  ;;  %v211_v55 = vld [vmem:[#allocation5 + $0x68] sm:$0xff]  ;;  %v245_v56 = vld [vmem:[#allocation5 + $0x178] sm:$0xff] }
  0x21   :  { %317 = vmatpush.msrb.mxu2 %v223_v32  ;;  %339 = vmatpush.msrb.mxu3 %v257_v33  ;;  %v208_v57 = vld [vmem:[#allocation5 + $0x50] sm:$0xff]  ;;  %v242_v58 = vld [vmem:[#allocation5 + $0x160] sm:$0xff]  ;;  %v209_v59 = vld [vmem:[#allocation5 + $0x58] sm:$0xff] }
  0x22   :  { %273 = vmatpush.msrb.mxu0 %v218_v38  ;;  %296 = vmatpush.msrb.mxu1 %v250_v39  ;;  %v243_v60 = vld [vmem:[#allocation5 + $0x168] sm:$0xff]  ;;  %v206_v61 = vld [vmem:[#allocation5 + $0x40] sm:$0xff]  ;;  %v240_v62 = vld [vmem:[#allocation5 + $0x150] sm:$0xff] }
  0x23   :  { %318 = vmatpush.msrb.mxu2 %v221_v36  ;;  %340 = vmatpush.msrb.mxu3 %v255_v37  ;;  %v207_v63 = vld [vmem:[#allocation5 + $0x48] sm:$0xff]  ;;  %v241_v0 = vld [vmem:[#allocation5 + $0x158] sm:$0xff]  ;;  %v204_v1 = vld [vmem:[#allocation5 + $0x30] sm:$0xff] }
  0x24   :  { %274 = vmatpush.msrb.mxu0 %v216_v42  ;;  %297 = vmatpush.msrb.mxu1 %v248_v43  ;;  %v238_v2 = vld [vmem:[#allocation5 + $0x140] sm:$0xff]  ;;  %v205_v3 = vld [vmem:[#allocation5 + $0x38] sm:$0xff]  ;;  %v239_v4 = vld [vmem:[#allocation5 + $0x148] sm:$0xff] }
  0x25   :  { %319 = vmatpush.msrb.mxu2 %v219_v40  ;;  %341 = vmatpush.msrb.mxu3 %v253_v41  ;;  %v202_v5 = vld [vmem:[#allocation5 + $0x20] sm:$0xff]  ;;  %v236_v6 = vld [vmem:[#allocation5 + $0x130] sm:$0xff]  ;;  %v203_v7 = vld [vmem:[#allocation5 + $0x28] sm:$0xff] }
  0x26   :  { %275 = vmatpush.msrb.mxu0 %v214_v46  ;;  %489 = vmatmul.msk.f32.vlgmr.msra.gmra.mxu2 %vm93_vm0, %v641_v12  ;;  %v237_v8 = vld [vmem:[#allocation5 + $0x138] sm:$0xff]  ;;  %v200_v9 = vld [vmem:[#allocation5 + $0x10] sm:$0xff]  ;;  %v234_v10 = vld [vmem:[#allocation5 + $0x120] sm:$0xff] }
  0x27   :  { %320 = vmatpush.msrb.mxu2 %v217_v44  ;;  %342 = vmatpush.msrb.mxu3 %v251_v45  ;;  %v201_v11 = vld [vmem:[#allocation5 + $0x18] sm:$0xff]  ;;  %v198_v13 = vld [vmem:[#allocation5] sm:$0xff]  ;;  %v232_v14 = vld [vmem:[#allocation5 + $0x110] sm:$0xff] }
  0x28   :  { %276 = vmatpush.msrb.mxu0 %v212_v49  ;;  %298 = vmatpush.msrb.mxu1 %v246_v50  ;;  %v199_v15 = vld [vmem:[#allocation5 + $0x8] sm:$0xff]  ;;  %v233_v17 = vld [vmem:[#allocation5 + $0x118] sm:$0xff]  ;;  %v230_v19 = vld [vmem:[#allocation5 + $0x100] sm:$0xff] }
  0x29   :  { %321 = vmatpush.msrb.mxu2 %v215_v47  ;;  %343 = vmatpush.msrb.mxu3 %v249_v48  ;;  %v65_v18 = vld [vmem:[%s699_s0] sm:$0xff]  ;;  %v231_v20 = vld [vmem:[#allocation5 + $0x108] sm:$0xff] }
  0x2a   :  { %491 = vmatmul.msk.f32.vlgmr.msra.gmra.mxu3 %vm93_vm0, %v641_v12  ;;  %277 = vmatpush.msrb.mxu0 %v210_v53  ;;  %v235_v12 = vld [vmem:[#allocation5 + $0x128] sm:$0xff]  ;;  %v673_v25 = vld [vmem:[%s702_s3] sm:$0xf] }
  0x2b   :  { %322 = vmatpush.msrb.mxu2 %v213_v51  ;;  %344 = vmatpush.msrb.mxu3 %v247_v52  ;;  %v66_v21 = vld [vmem:[%s699_s0 + $0x8] sm:$0xff]  ;;  %v85_v26 = vperm.slane %v673_v25, 0  ;;  %v680_v40 = vld [vmem:[%s704_s5] sm:$0x3]  ;;  %s582_s5 = smov 64  }
  0x2c   :  { %299 = vmatpush.msrb.mxu1 %v244_v54  ;;  %278 = vmatpush.msrb.mxu0 %v208_v57  ;;  %v264_v41 = vperm.slane %v680_v40, 0 }
  0x2d   :  { %323 = vmatpush.msrb.mxu2 %v211_v55  ;;  %345 = vmatpush.msrb.mxu3 %v245_v56 }
  0x2e   :  { %300 = vmatpush.msrb.mxu1 %v242_v58  ;;  %279 = vmatpush.msrb.mxu0 %v206_v61 }
  0x2f   :  { %324 = vmatpush.msrb.mxu2 %v209_v59  ;;  %346 = vmatpush.msrb.mxu3 %v243_v60 }
  0x30   :  { %301 = vmatpush.msrb.mxu1 %v240_v62  ;;  %490 = vmatmul.msk.f32.gmra.mxu2 %vm93_vm0, %v650_v27 }
  0x31   :  { %325 = vmatpush.msrb.mxu2 %v207_v63  ;;  %347 = vmatpush.msrb.mxu3 %v241_v0  ;;  %v87_v0 = vperm.slane %v673_v25, 2 }
  0x32   :  { %280 = vmatpush.msrb.mxu0 %v204_v1  ;;  %302 = vmatpush.msrb.mxu1 %v238_v2 }
  0x33   :  { %326 = vmatpush.msrb.mxu2 %v205_v3  ;;  %348 = vmatpush.msrb.mxu3 %v239_v4  ;;  %v513_v4 = vld [vmem:[%s705_s6] ss:$0 sm:$0xff] }
  0x34   :  { %492 = vmatmul.msk.f32.gmra.mxu3 %vm93_vm0, %v650_v27  ;;  %281 = vmatpush.msrb.mxu0 %v202_v5  ;;  %v86_v27 = vperm.slane %v673_v25, 1 }
  0x35   :  { %303 = vmatpush.msrb.mxu1 %v236_v6  ;;  %327 = vmatpush.msrb.mxu2 %v203_v7 }
  0x36   :  { %349 = vmatpush.msrb.mxu3 %v237_v8  ;;  %282 = vmatpush.msrb.mxu0 %v200_v9 }
  0x37   :  { %304 = vmatpush.msrb.mxu1 %v234_v10  ;;  %328 = vmatpush.msrb.mxu2 %v201_v11 }
  0x38   :  { %350 = vmatpush.msrb.mxu3 %v235_v12  ;;  %507 = vset.pattern.permute.xlu0 %v577_v16 }
  0x39   :  { %283 = vmatpush.msrb.mxu0 %v198_v13  ;;  %305 = vmatpush.msrb.mxu1 %v232_v14  ;;  %v88_v14 = vperm.slane %v673_v25, 3 }
  0x3a   :  { %329 = vmatpush.msrb.mxu2 %v199_v15  ;;  %351 = vmatpush.msrb.mxu3 %v233_v17 }
  0x3b   :  { %395 = vperm.xlu0 %507, %v65_v18   ;;  %306 = vmatpush.msrb.mxu1 %v230_v19 }
  0x3c   :  { %352 = vmatpush.msrb.mxu3 %v231_v20  ;;  %508 = vset.pattern.permute.xlu1 %v578_v22 }
  0x3d   :  { %415 = vperm.xlu1 %508, %v65_v18   ;;  %509 = vset.pattern.permute.xlu2 %v579_v23 }
  0x3e   :  { %435 = vperm.xlu2 %509, %v65_v18  }
  0x43   :  { %399 = vperm.xlu0 %507, %v66_v21  }
  0x45   :  { %419 = vperm.xlu1 %508, %v66_v21  }
  0x46   :  { %439 = vperm.xlu2 %509, %v66_v21  }
  0x4b   :  { %510 = vset.pattern.permute.xlu0 %v580_v24 }
  0x4c   :  { %382 = vperm.xlu0 %510, %v65_v18  }
  0x4d   :  { %511 = vset.pattern.permute.xlu1 %v580_v24 }
  0x4e   :  { %387 = vperm.xlu1 %511, %v66_v21  }
  0x54   :  { %512 = vset.pattern.permute.xlu0 %v579_v23 }
  0x93   :  { %v117_v28 = vpop.f32.mrf.mxu0  ;;  %v140_v29 = vpop.f32.mrf.mxu1 }
  0x94   :  { %v118_v30 = vadd.f32 %v117_v28, %v85_v26  ;;  %v141_v31 = vadd.f32 %v140_v29, %v86_v27 }
  0x96   :  { %v192_v32 = vmax.f32 %v118_v30, 0.0  ;;  %v193_v33 = vmax.f32 %v141_v31, 0.0 }
  0x98   :  { %284 = vmatmul.f32.vlgmr.msrb.gmra.mxu0 %v192_v32  ;;  %330 = vmatmul.f32.vlgmr.msrb.gmra.mxu2 %v192_v32  ;;  %v436_v53 = vpop.permute.xlu2 %435 }
  0x99   :  { %307 = vmatmul.f32.vlgmr.msrb.gmra.mxu1 %v193_v33  ;;  %353 = vmatmul.f32.vlgmr.msrb.gmra.mxu3 %v193_v33 }
  0x9b   :  { %v120_v34 = vpop.f32.mrf.mxu0  ;;  %v143_v35 = vpop.f32.mrf.mxu1 }
  0x9c   :  { %v121_v36 = vadd.f32 %v120_v34, %v85_v26  ;;  %v144_v37 = vadd.f32 %v143_v35, %v86_v27 }
  0x9e   :  { %v195_v38 = vmax.f32 %v121_v36, 0.0  ;;  %v196_v39 = vmax.f32 %v144_v37, 0.0  ;;  %v265_v36 = vperm.slane %v680_v40, 1 }
  0xa0   :  { %287 = vmatmul.f32.gmra.mxu0 %v195_v38  ;;  %333 = vmatmul.f32.gmra.mxu2 %v195_v38  ;;  %v440_v61 = vpop.permute.xlu2 %439 }
  0xa1   :  { %310 = vmatmul.f32.gmra.mxu1 %v196_v39  ;;  %356 = vmatmul.f32.gmra.mxu3 %v196_v39 }
  0xa9   :  { %v163_v1 = vpop.f32.mrf.mxu2 }
  0xaa   :  { %v164_v2 = vadd.f32 %v163_v1, %v87_v0 }
  0xac   :  { %v194_v3 = vmax.f32 %v164_v2, 0.0 }
  0xad   :  { %v396_v47 = vpop.permute.xlu0 %395  ;;  %v186_v9 = vpop.f32.mrf.mxu3 }
  0xae   :  { %v368_v7 = vmul.f32 %v513_v4, %v194_v3  ;;  %v187_v20 = vadd.f32 %v186_v9, %v88_v14 }
  0xaf   :  { %v416_v46 = vpop.permute.xlu1 %415 }
  0xb3   :  { %v166_v5 = vpop.f32.mrf.mxu2 }
  0xb4   :  { %v167_v6 = vadd.f32 %v166_v5, %v87_v0 }
  0xb5   :  { %v400_v57 = vpop.permute.xlu0 %399 }
  0xb6   :  { %v197_v8 = vmax.f32 %v167_v6, 0.0 }
  0xb7   :  { %v420_v56 = vpop.permute.xlu1 %419  ;;  %v189_v12 = vpop.f32.mrf.mxu3 }
  0xb8   :  { %v369_v10 = vmul.f32 %v513_v4, %v197_v8  ;;  %v190_v17 = vadd.f32 %v189_v12, %v88_v14 }
  0xbe   :  { %v383_v15 = vpop.permute.xlu0 %382 }
  0xc0   :  { %v388_v13 = vpop.permute.xlu1 %387 }
 0x115   :  { %v285_v42 = vpop.f32.mrf.mxu0 }
 0x116   :  { %v286_v43 = vadd.f32 %v285_v42, %v264_v41  ;;  %v308_v44 = vpop.f32.mrf.mxu1 }
 0x118   :  { %v309_v45 = vadd.f32 %v308_v44, %v286_v43 }
 0x11a   :  { %v360_v48 = vand.u32 2147483647, %v309_v45 }
 0x11b   :  { %v331_v19 = vpop.f32.mrf.mxu2 }
 0x11c   :  { %v402_v49 = vmul.f32 %v396_v47, %v360_v48  ;;  %v422_v59 = vmul.f32 %v416_v46, %v360_v48  ;;  %v442_v63 = vmul.f32 %v436_v53, %v360_v48  ;;  %v390_v21 = vmul.f32 %v383_v15, %v360_v48  ;;  %v354_v26 = vpop.f32.mrf.mxu3 }
 0x11d   :  { %v288_v50 = vpop.f32.mrf.mxu0  ;;  %v332_v44 = vadd.f32 %v331_v19, %v265_v36 }
 0x11e   :  { %v289_v51 = vadd.f32 %v288_v50, %v264_v41  ;;  %406 = vrot.lane.b32.xlu2 %v402_v49, %s581_s27  ;;  %v311_v52 = vpop.f32.mrf.mxu1  ;;  %v392_v28 = vadd.f32 %v390_v21, %v187_v20 }
 0x11f   :  { %v355_v48 = vadd.f32 %v354_v26, %v332_v44 }
 0x120   :  { %v312_v54 = vadd.f32 %v311_v52, %v289_v51 }
 0x121   :  { %v362_v40 = vand.u32 2147483647, %v355_v48 }
 0x122   :  { %v361_v55 = vand.u32 2147483647, %v312_v54 }
 0x123   :  { %v334_v25 = vpop.f32.mrf.mxu2 }
 0x124   :  { %v423_v58 = vmul.f32 %v420_v56, %v361_v55  ;;  %v403_v60 = vmul.f32 %v400_v57, %v361_v55  ;;  %v443_v62 = vmul.f32 %v440_v61, %v361_v55  ;;  %v391_v18 = vmul.f32 %v388_v13, %v361_v55  ;;  %v357_v42 = vpop.f32.mrf.mxu3 }
 0x125   :  { %v335_v39 = vadd.f32 %v334_v25, %v265_v36 }
 0x126   :  { %428 = vrot.lane.b32.xlu0 %v423_v58, %s582_s5  ;;  %426 = vrot.lane.b32.xlu2 %v422_v59, %s582_s5  ;;  %v393_v22 = vadd.f32 %v391_v18, %v190_v17  ;;  %v514_v58 = vld [vmem:[#allocation2] ss:$0 sm:$0xff] }
 0x127   :  { %408 = vrot.lane.b32.xlu1 %v403_v60, %s581_s27  ;;  %v358_v45 = vadd.f32 %v357_v42, %v335_v39 }
 0x129   :  { %v363_v49 = vand.u32 2147483647, %v358_v45 }
 0x12e   :  { %448 = vrot.lane.b32.xlu2 %v443_v62, %s573_s16 }
 0x12f   :  { %446 = vrot.lane.b32.xlu1 %v442_v63, %s573_s16 }
 0x150   :  { %370 = vadd.xlane.f32.xlu0 %v368_v7 }
 0x159   :  { %372 = vadd.xlane.f32.xlu1 %v369_v10 }
 0x178   :  { %v407_v11 = vpop.permute.xlu2 %406 }
 0x179   :  { %v412_v31 = vadd.f32 %v407_v11, %v392_v28 }
 0x180   :  { %v427_v16 = vpop.permute.xlu2 %426 }
 0x181   :  { %v432_v33 = vadd.f32 %v427_v16, %v412_v31 }
 0x188   :  { %v449_v30 = vpop.permute.xlu2 %448 }
 0x198   :  { %v429_v27 = vpop.permute.xlu0 %428 }
 0x199   :  { %v409_v23 = vpop.permute.xlu1 %408 }
 0x19a   :  { %v413_v24 = vadd.f32 %v409_v23, %v393_v22 }
 0x19c   :  { %v433_v29 = vadd.f32 %v429_v27, %v413_v24 }
 0x19e   :  { %v453_v32 = vadd.f32 %v449_v30, %v433_v29 }
 0x1a0   :  { %v457_v34 = vmin.f32 %v453_v32, 0.0  ;;  %vm455_vm1 = vcmp.gt.f32.partialorder %v453_v32, 0.0 }
 0x1a1   :  { %v447_v35 = vpop.permute.xlu1 %446 }
 0x1a2   :  { %v460_v37 = vmul.f32 1.442695, %v457_v34  ;;  %v452_v38 = vadd.f32 %v447_v35, %v432_v33 }
 0x1a4   :  { %v456_v41 = vmin.f32 %v452_v38, 0.0  ;;  %515 = vpow2.f32 %v460_v37  ;;  %vm454_vm2 = vcmp.gt.f32.partialorder %v452_v38, 0.0 }
 0x1a6   :  { %v458_v43 = vmul.f32 1.442695, %v456_v41 }
 0x1a8   :  { %517 = vpow2.f32 %v458_v43 }
 0x1aa   :  { %v516_v46 = vpop.eup %515 }
 0x1ab   :  { %v494_v47 = vadd.f32 -1.0, %v516_v46 }
 0x1ad   :  { %v465_v50 = vsel %vm455_vm1, %v453_v32, %v494_v47 }
 0x1ae   :  { %v518_v51 = vpop.eup %517  ;;  %v467_v52 = vmul.f32 %v465_v50, %v363_v49 }
 0x1af   :  { %v493_v53 = vadd.f32 -1.0, %v518_v51 }
 0x1b0   :  { %v471_v57 = vsel %vm93_vm0, %v467_v52, 0.0 }
 0x1b1   :  { %v464_v54 = vsel %vm454_vm2, %v452_v38, %v493_v53 }
 0x1b2   :  { %v466_v55 = vmul.f32 %v464_v54, %v362_v40 }
 0x1b4   :  { %v468_v56 = vsel %vm93_vm0, %v466_v55, 0.0 }
 0x1b5   :  { %469 = vadd.xlane.f32.xlu2 %v468_v56 }
 0x1bd   :  { %472 = vadd.xlane.f32.xlu2 %v471_v57 }
 0x1c3   :  { %v371_v59 = vpop.xlane.xlu0 %370 }
 0x1c4   :  { %v378_v60 = vadd.f32 %v514_v58, %v371_v59 }
 0x1cc   :  { %v373_v63 = vpop.xlane.xlu1 %372 }
 0x1cd   :  { %v379_v0 = vadd.f32 %v514_v58, %v373_v63 }
 0x228   :  { %v470_v61 = vpop.xlane.xlu2 %469 }
 0x229   :  { %v474_v62 = vadd.f32 %v470_v61, %v378_v60 }
 0x22b   :  { %477 = vst.msk [vmem:[%s707_s8] sm:$0xff] %vm476_vm3, %v474_v62 }
 0x230   :  { %v473_v1 = vpop.xlane.xlu2 %472 }
 0x231   :  { %v475_v2 = vadd.f32 %v473_v1, %v379_v0 }
 0x233   :  { %478 = vst.msk [vmem:[%s707_s8 + $0x8] sm:$0xff] %vm476_vm3, %v475_v2 }
 0x234   :  { %483 = vsyncpa [#allocation4], 1 }
 0x235   :  { %484 = vsyncpa [#allocation6], 1 }

</bundles_post_ra>
